<compile_context>
chip_gen: v7x
topology: tpu7x:2x2x1
jax: 0.10.0
libtpu: 0.0.40
codegen_flags: <defaults>
</compile_context>

<pallas_src>
import jax
import jax.numpy as jnp
from jax.experimental import pallas as pl
from jax.experimental.pallas import tpu as pltpu


def mlp_kernel(x_ref, w1_ref, b1_ref, w2_ref, b2_ref, w3t_ref, b3_ref, o_ref):
    x = x_ref[...]                       # (TB, X_dim)
    w1 = w1_ref[...]                     # (X_dim, h_dim)
    x_dim = x_ref.shape[1]

    # Layer 1 on the VPU: K = X_dim (=2) would be a degenerate MXU matmul,
    # so unroll it into per-input-column FMAs (broadcast over lanes).
    h1 = x[:, 0:1] * w1[0:1, :]
    for d in range(1, x_dim):
        h1 = h1 + x[:, d:d + 1] * w1[d:d + 1, :]
    h1 = jnp.maximum(h1 + b1_ref[...], 0.0)

    # Layer 2: h_dim x h_dim matmul on the MXU, f32 accumulate; ReLU on VPU.
    h2 = jnp.dot(h1, w2_ref[...], preferred_element_type=jnp.float32)
    h2 = jnp.maximum(h2 + b2_ref[...], 0.0)

    # Layer 3 (N = 1): VPU multiply + cross-lane reduce (XLU) instead of a
    # 1-output-lane MXU matmul; store the narrow [TB, 1] column directly.
    o_ref[...] = (
        jnp.sum(h2 * w3t_ref[...], axis=-1, keepdims=True) + b3_ref[...]
    )


def _round8(n):
    return ((n + 7) // 8) * 8


def net_forward(x, params, *, block_b=8192, min_split=512):
    """x: [B, X_dim] f32 -> [B, 1] f32 (same semantics as Net.forward)."""
    w1, b1, w2, b2, w3, b3 = params
    B, X_dim = x.shape
    h_dim = w1.shape[1]

    # (h_dim, 1) -> (1, h_dim): trivial reshape (no data movement), done once
    # in the wrapper so the kernel sees a lane-major weight row.
    w3t = w3.reshape(1, h_dim)

    # Batch tile choice:
    #   * small batches -> single step covering the whole (8-padded) batch;
    #   * large batches -> tiles capped at block_b, but always >= 2 grid
    #     steps so the "parallel" batch axis can use both v7x TensorCores.
    B8 = _round8(B)
    if B8 <= min_split:
        TB = B8
    else:
        n_steps = max(2, -(-B8 // block_b))
        TB = _round8(-(-B8 // n_steps))
    Bp = -(-B // TB) * TB
    xp = x if Bp == B else jnp.pad(x, ((0, Bp - B), (0, 0)))

    out = pl.pallas_call(
        mlp_kernel,
        out_shape=jax.ShapeDtypeStruct((Bp, 1), jnp.float32),
        grid_spec=pltpu.PrefetchScalarGridSpec(
            num_scalar_prefetch=0,
            grid=(Bp // TB,),
            in_specs=[
                pl.BlockSpec((TB, X_dim), lambda i: (i, 0)),      # x tile
                pl.BlockSpec((X_dim, h_dim), lambda i: (0, 0)),   # w1 (resident)
                pl.BlockSpec((1, h_dim), lambda i: (0, 0)),       # b1 (resident)
                pl.BlockSpec((h_dim, h_dim), lambda i: (0, 0)),   # w2 (resident)
                pl.BlockSpec((1, h_dim), lambda i: (0, 0)),       # b2 (resident)
                pl.BlockSpec((1, h_dim), lambda i: (0, 0)),       # w3^T (resident)
                pl.BlockSpec((1, 1), lambda i: (0, 0)),           # b3 (resident)
            ],
            out_specs=pl.BlockSpec((TB, 1), lambda i: (i, 0)),
        ),
        compiler_params=pltpu.CompilerParams(
            dimension_semantics=("parallel",),  # shards batch across TCs on v7x
        ),
    )(xp, w1, b1, w2, b2, w3t, b3)

    # Strip batch padding only when it was added.
    return out if Bp == B else out[:B]


def xavier_uniform(key, fan_in, fan_out):
    # Matches torch.nn.init.xavier_uniform_ bound: sqrt(6 / (fan_in + fan_out)).
    bound = (6.0 / (fan_in + fan_out)) ** 0.5
    return jax.random.uniform(key, (fan_in, fan_out), jnp.float32, -bound, bound)


def init_params(key, X_dim=2, h_dim=64):
    k1, k2, k3, kb1, kb2, kb3 = jax.random.split(key, 6)
    # Weights: xavier_uniform (as in Net.init_weights), stored (in, out).
    w1 = xavier_uniform(k1, X_dim, h_dim)
    w2 = xavier_uniform(k2, h_dim, h_dim)
    w3 = xavier_uniform(k3, h_dim, 1)
    # Biases: PyTorch Linear default uniform(-1/sqrt(fan_in), 1/sqrt(fan_in)),
    # kept 2D so they broadcast cleanly inside the kernel.
    b1 = jax.random.uniform(kb1, (1, h_dim), jnp.float32,
                            -1.0 / X_dim ** 0.5, 1.0 / X_dim ** 0.5)
    b2 = jax.random.uniform(kb2, (1, h_dim), jnp.float32,
                            -1.0 / h_dim ** 0.5, 1.0 / h_dim ** 0.5)
    b3 = jax.random.uniform(kb3, (1, 1), jnp.float32,
                            -1.0 / h_dim ** 0.5, 1.0 / h_dim ** 0.5)
    return (w1, b1, w2, b2, w3, b3)


def reference_forward(x, params):
    w1, b1, w2, b2, w3, b3 = params
    h1 = jnp.maximum(x @ w1 + b1, 0.0)
    h2 = jnp.maximum(h1 @ w2 + b2, 0.0)
    return h2 @ w3 + b3


if __name__ == "__main__":
    key = jax.random.PRNGKey(0)
    kx, kp = jax.random.split(key)

    X_dim, h_dim, batch = 2, 64, 16
    x = jax.random.normal(kx, (batch, X_dim), jnp.float32)
    params = init_params(kp, X_dim=X_dim, h_dim=h_dim)

    out = net_forward(x, params)
    out = jax.block_until_ready(out)

    ref = reference_forward(x, params)
    assert out.shape == (batch, 1)
    assert jnp.allclose(out, ref, atol=1e-5, rtol=1e-5)

    print("KERNEL_OK")
</pallas_src>

<mosaic_0001>
module attributes {stable_mosaic.version = 11 : i64} {
  func.func @mlp_kernel(%arg0: i32, %arg1: memref<16x2xf32, #tpu.memory_space<vmem>>, %arg2: memref<2x64xf32, #tpu.memory_space<vmem>>, %arg3: memref<1x64xf32, #tpu.memory_space<vmem>>, %arg4: memref<64x64xf32, #tpu.memory_space<vmem>>, %arg5: memref<1x64xf32, #tpu.memory_space<vmem>>, %arg6: memref<1x64xf32, #tpu.memory_space<vmem>>, %arg7: memref<1x1xf32, #tpu.memory_space<vmem>>, %arg8: memref<16x1xf32, #tpu.memory_space<vmem>>) attributes {dimension_semantics = [#tpu.dimension_semantics<parallel>], iteration_bounds = array<i64: 1>, scalar_prefetch = 0 : i64, scratch_operands = 0 : i64, tpu.core_type = #tpu.core_type<tc>, window_params = [{transform_indices = @transform_0, window_bounds = array<i64: 16, 2>}, {pipeline_mode = #tpu.pipeline_mode<synchronous>, transform_indices = @transform_1, window_bounds = array<i64: 2, 64>}, {pipeline_mode = #tpu.pipeline_mode<synchronous>, transform_indices = @transform_2, window_bounds = array<i64: 1, 64>}, {pipeline_mode = #tpu.pipeline_mode<synchronous>, transform_indices = @transform_3, window_bounds = array<i64: 64, 64>}, {pipeline_mode = #tpu.pipeline_mode<synchronous>, transform_indices = @transform_4, window_bounds = array<i64: 1, 64>}, {pipeline_mode = #tpu.pipeline_mode<synchronous>, transform_indices = @transform_5, window_bounds = array<i64: 1, 64>}, {pipeline_mode = #tpu.pipeline_mode<synchronous>, transform_indices = @transform_6, window_bounds = array<i64: 1, 1>}, {transform_indices = @transform_7, window_bounds = array<i64: 16, 1>}]} {
    %c0 = arith.constant 0 : index
    %c0_0 = arith.constant 0 : index
    %0 = vector.load %arg1[%c0, %c0_0] : memref<16x2xf32, #tpu.memory_space<vmem>>, vector<16x2xf32>
    %c0_1 = arith.constant 0 : index
    %c0_2 = arith.constant 0 : index
    %1 = vector.load %arg2[%c0_1, %c0_2] : memref<2x64xf32, #tpu.memory_space<vmem>>, vector<2x64xf32>
    %2 = vector.extract_strided_slice %0 {offsets = [0, 0], sizes = [16, 1], strides = [1, 1]} : vector<16x2xf32> to vector<16x1xf32>
    %3 = vector.extract_strided_slice %1 {offsets = [0, 0], sizes = [1, 64], strides = [1, 1]} : vector<2x64xf32> to vector<1x64xf32>
    %4 = vector.broadcast %2 : vector<16x1xf32> to vector<16x64xf32>
    %5 = vector.broadcast %3 : vector<1x64xf32> to vector<16x64xf32>
    %6 = arith.mulf %4, %5 : vector<16x64xf32>
    %7 = vector.extract_strided_slice %0 {offsets = [0, 1], sizes = [16, 1], strides = [1, 1]} : vector<16x2xf32> to vector<16x1xf32>
    %8 = vector.extract_strided_slice %1 {offsets = [1, 0], sizes = [1, 64], strides = [1, 1]} : vector<2x64xf32> to vector<1x64xf32>
    %9 = vector.broadcast %7 : vector<16x1xf32> to vector<16x64xf32>
    %10 = vector.broadcast %8 : vector<1x64xf32> to vector<16x64xf32>
    %11 = arith.mulf %9, %10 : vector<16x64xf32>
    %12 = arith.addf %6, %11 : vector<16x64xf32>
    %c0_3 = arith.constant 0 : index
    %c0_4 = arith.constant 0 : index
    %13 = vector.load %arg3[%c0_3, %c0_4] : memref<1x64xf32, #tpu.memory_space<vmem>>, vector<1x64xf32>
    %14 = vector.broadcast %13 : vector<1x64xf32> to vector<16x64xf32>
    %15 = arith.addf %12, %14 : vector<16x64xf32>
    %cst = arith.constant 0.000000e+00 : f32
    %16 = vector.broadcast %cst : f32 to vector<16x64xf32>
    %17 = arith.maximumf %15, %16 : vector<16x64xf32>
    %c0_5 = arith.constant 0 : index
    %c0_6 = arith.constant 0 : index
    %18 = vector.load %arg4[%c0_5, %c0_6] : memref<64x64xf32, #tpu.memory_space<vmem>>, vector<64x64xf32>
    %cst_7 = arith.constant dense<0.000000e+00> : vector<16x64xf32>
    %19 = tpu.matmul %17, %18, %cst_7 {dimension_numbers = #tpu.dot_dimension_numbers<[1], [0], [0], [1], [0, 0, 1, 1], [], []>} : vector<16x64xf32>, vector<64x64xf32>, vector<16x64xf32> -> vector<16x64xf32>
    %c0_8 = arith.constant 0 : index
    %c0_9 = arith.constant 0 : index
    %20 = vector.load %arg5[%c0_8, %c0_9] : memref<1x64xf32, #tpu.memory_space<vmem>>, vector<1x64xf32>
    %21 = vector.broadcast %20 : vector<1x64xf32> to vector<16x64xf32>
    %22 = arith.addf %19, %21 : vector<16x64xf32>
    %cst_10 = arith.constant 0.000000e+00 : f32
    %23 = vector.broadcast %cst_10 : f32 to vector<16x64xf32>
    %24 = arith.maximumf %22, %23 : vector<16x64xf32>
    %c0_11 = arith.constant 0 : index
    %c0_12 = arith.constant 0 : index
    %25 = vector.load %arg6[%c0_11, %c0_12] : memref<1x64xf32, #tpu.memory_space<vmem>>, vector<1x64xf32>
    %26 = vector.broadcast %25 : vector<1x64xf32> to vector<16x64xf32>
    %27 = arith.mulf %24, %26 : vector<16x64xf32>
    %cst_13 = arith.constant dense<0.000000e+00> : vector<16xf32>
    %28 = vector.multi_reduction <add>, %27, %cst_13 [1] : vector<16x64xf32> to vector<16xf32>
    %29 = vector.shape_cast %28 : vector<16xf32> to vector<16x1xf32>
    %c0_14 = arith.constant 0 : index
    %c0_15 = arith.constant 0 : index
    %30 = vector.load %arg7[%c0_14, %c0_15] : memref<1x1xf32, #tpu.memory_space<vmem>>, vector<1x1xf32>
    %31 = vector.broadcast %30 : vector<1x1xf32> to vector<16x1xf32>
    %32 = arith.addf %29, %31 : vector<16x1xf32>
    %c0_16 = arith.constant 0 : index
    %c0_17 = arith.constant 0 : index
    %33 = vector.load %arg8[%c0_16, %c0_17] : memref<16x1xf32, #tpu.memory_space<vmem>>, vector<16x1xf32>
    tpu.vector_store %arg8[%c0_16, %c0_17], %32 {strides = array<i32>} : memref<16x1xf32, #tpu.memory_space<vmem>>, vector<16x1xf32>,
    return
  }
  func.func @transform_0(%arg0: i32) -> (i32, i32) {
    %c0_i32 = arith.constant 0 : i32
    %c0_i32_0 = arith.constant 0 : i32
    return %arg0, %c0_i32 : i32, i32
  }
  func.func @transform_1(%arg0: i32) -> (i32, i32) {
    %c0_i32 = arith.constant 0 : i32
    %c0_i32_0 = arith.constant 0 : i32
    %c0_i32_1 = arith.constant 0 : i32
    return %c0_i32, %c0_i32_0 : i32, i32
  }
  func.func @transform_2(%arg0: i32) -> (i32, i32) {
    %c0_i32 = arith.constant 0 : i32
    %c0_i32_0 = arith.constant 0 : i32
    %c0_i32_1 = arith.constant 0 : i32
    return %c0_i32, %c0_i32_0 : i32, i32
  }
  func.func @transform_3(%arg0: i32) -> (i32, i32) {
    %c0_i32 = arith.constant 0 : i32
    %c0_i32_0 = arith.constant 0 : i32
    %c0_i32_1 = arith.constant 0 : i32
    return %c0_i32, %c0_i32_0 : i32, i32
  }
  func.func @transform_4(%arg0: i32) -> (i32, i32) {
    %c0_i32 = arith.constant 0 : i32
    %c0_i32_0 = arith.constant 0 : i32
    %c0_i32_1 = arith.constant 0 : i32
    return %c0_i32, %c0_i32_0 : i32, i32
  }
  func.func @transform_5(%arg0: i32) -> (i32, i32) {
    %c0_i32 = arith.constant 0 : i32
    %c0_i32_0 = arith.constant 0 : i32
    %c0_i32_1 = arith.constant 0 : i32
    return %c0_i32, %c0_i32_0 : i32, i32
  }
  func.func @transform_6(%arg0: i32) -> (i32, i32) {
    %c0_i32 = arith.constant 0 : i32
    %c0_i32_0 = arith.constant 0 : i32
    %c0_i32_1 = arith.constant 0 : i32
    return %c0_i32, %c0_i32_0 : i32, i32
  }
  func.func @transform_7(%arg0: i32) -> (i32, i32) {
    %c0_i32 = arith.constant 0 : i32
    %c0_i32_0 = arith.constant 0 : i32
    return %arg0, %c0_i32 : i32, i32
  }
}

</mosaic_0001>

<bundles_post_ra>
// kernel: tpu_custom_call.1
= control target key start
LH: loop header
LB: loop body
LE: loop exit
PB: predicated region body
PF: predicated region fallthrough
CT: control target
= control target key end

     0   :  { %s391_s0 = inlined_call_operand.vmem [shape: f32[16,2], index: 0, kind: input, shape index: {}]   ;;  %s392_s1 = inlined_call_operand.vmem [shape: f32[2,64], index: 1, kind: input, shape index: {}]   ;;  %s393_s2 = inlined_call_operand.vmem [shape: f32[1,64], index: 2, kind: input, shape index: {}]   ;;  %s394_s3 = inlined_call_operand.hbm [shape: f32[64,64], index: 3, kind: input, shape index: {}]   ;;  %s395_s4 = inlined_call_operand.vmem [shape: f32[1,64], index: 4, kind: input, shape index: {}]   ;;  %s396_s5 = inlined_call_operand.vmem [shape: f32[1,64], index: 5, kind: input, shape index: {}]   ;;  %s397_s6 = inlined_call_operand.<no memory space> [shape: f32[1,1], index: 6, kind: input, shape index: {}]   ;;  %s398_s7 = inlined_call_operand.vmem [shape: f32[16,1], index: 7, kind: output, shape index: {}]  }
   0x1   :  { %v12_v0 = vstv %s397_s6 }
   0x2   :  { %13 = vst [vmem:[#allocation2] sm:$0x1] %v12_v0 }
   0x3   :  { %14 = vsyncpa [#allocation4], 0  ;;  %s303_s26 = smov [#allocation3]   ;;  %s279_s30 = scalar_lea.hbm %s394_s3, 1024 }
   0x4   :  { %s26_s27 = sshll.u32 %s303_s26, 4  ;;  %p280_p0 = scmp.ne.s32.totalorder %s394_s3, %s279_s30  ;;  %s27_s27 = int_to_ptr.vmem [resolvable:$true] %s26_s27 }
   0x5   :  { %p283_p1 = scmp.lt.u32.totalorder %s279_s30, %s394_s3 }
   0x7   :  { %p285_p2 = pnand %p283_p1, %p280_p0 }
   0x9   :  { %288 = shalt.err (!%p285_p2)
}
   0xa   :  { %s289_s6 = scalar_lea.vmem %s27_s27, 1024  ;;  %p294_p4 = scmp.lt.s32.totalorder %s27_s27, %s27_s27 }
   0xb   :  { %p290_p3 = scmp.ne.s32.totalorder %s27_s27, %s289_s6  ;;  %p295_p5 = scmp.lt.s32.totalorder %s289_s6, %s289_s6 }
   0xd   :  { %p296_p6 = por %p295_p5, %p294_p4 }
   0xf   :  { %p297_p7 = pnand %p296_p6, %p290_p3 }
  0x11   :  { %300 = shalt.err (!%p297_p7)
}
  0x12   :  { %s304_s12 = smov 128   ;;  %s305_s13 = smov 8  }
  0x13   :  { %32 = dma.hbm_to_vmem [thread:$0]  %s394_s3, 1024, %s27_s27, [#allocation4], %s304_s12, %s304_s12, %s305_s13  }
  0x14   :  { %301 = dma.done.wait [#allocation4], 1024  }
  0x15   :  { %302 = vsyncadd [#allocation4], 4294966272  ;;  %v306_v1 = vmov 0   ;;  %v43_v2 = vld [vmem:[%s391_s0 + $0x8] sm:$0xff]  ;;  %v42_v3 = vld [vmem:[%s391_s0] sm:$0xff]  ;;  %v307_v10 = vmov 1   ;;  %v55_v17 = vlaneseq }
  0x16   :  { %277 = vset.pattern.permute.xlu1 %v306_v1  ;;  %275 = vset.pattern.permute.xlu0 %v306_v1  ;;  %v88_v4 = vld [vmem:[#allocation3] sm:$0xff]  ;;  %v89_v5 = vld [vmem:[#allocation3 + $0x8] sm:$0xff]  ;;  %v90_v6 = vld [vmem:[#allocation3 + $0x10] sm:$0xff]  ;;  %vm103_vm0 = vcmask 523264   ;;  %vm211_vm1 = vcmask 7168  }
  0x17   :  { %52 = vperm.xlu1 %277, %v43_v2   ;;  %47 = vperm.xlu0 %275, %v42_v3   ;;  %v254_v7 = vpack.c.bf16 %v89_v5, %v88_v4  ;;  %v91_v8 = vld [vmem:[#allocation3 + $0x18] sm:$0xff]  ;;  %v92_v11 = vld [vmem:[#allocation3 + $0x20] sm:$0xff]  ;;  %v93_v12 = vld [vmem:[#allocation3 + $0x28] sm:$0xff]  ;;  %v56_v18 = vshrl.u32 %v55_v17, 7 }
  0x18   :  { %v258_v9 = vpack.c.bf16 %v91_v8, %v90_v6  ;;  %v262_v13 = vpack.c.bf16 %v93_v12, %v92_v11  ;;  %v94_v14 = vld [vmem:[#allocation3 + $0x30] sm:$0xff]  ;;  %v95_v15 = vld [vmem:[#allocation3 + $0x38] sm:$0xff] }
  0x19   :  { %255 = vmatprep.subr.bf16.mxu0 %v254_v7  ;;  %v266_v16 = vpack.c.bf16 %v95_v15, %v94_v14  ;;  %v57_v19 = vsub.s32 0, %v56_v18  ;;  %v71_v20 = vsub.s32 1, %v56_v18  ;;  %v44_v21 = vld [vmem:[%s392_s1] sm:$0x3] }
  0x1a   :  { %257 = vmatpush3.bf16.msra.mxu0 %v254_v7  ;;  %v219_v32 = vld [vmem:[%s393_s2] ss:$0 sm:$0xff] }
  0x1b   :  { %278 = vset.pattern.permute.xlu1 %v307_v10  ;;  %276 = vset.pattern.permute.xlu0 %v307_v10  ;;  %v58_v24 = vrot.slane %v44_v21, %v57_v19  ;;  %v72_v25 = vrot.slane %v44_v21, %v71_v20  ;;  %v220_v39 = vld [vmem:[%s395_s4] ss:$0 sm:$0xff] }
  0x1c   :  { %66 = vperm.xlu1 %278, %v43_v2   ;;  %62 = vperm.xlu0 %276, %v42_v3   ;;  %v223_v44 = vld [vmem:[%s396_s5] ss:$0 sm:$0xff] }
  0x1d   :  { %259 = vmatprep.subr.bf16.mxu0 %v258_v9  ;;  %v224_v51 = vld [vmem:[#allocation2] ss:$0 sm:$0xff] }
  0x1e   :  { %261 = vmatpush3.bf16.msra.mxu0 %v258_v9 }
  0x1f   :  { %263 = vmatprep.subr.bf16.mxu0 %v262_v13 }
  0x22   :  { %265 = vmatpush3.bf16.msra.mxu0 %v262_v13 }
  0x23   :  { %267 = vmatprep.subr.bf16.mxu0 %v266_v16 }
  0x26   :  { %269 = vmatpush3.bf16.msra.mxu0 %v266_v16 }
  0x96   :  { %v48_v22 = vpop.permute.xlu0 %47  ;;  %v53_v23 = vpop.permute.xlu1 %52 }
  0x97   :  { %v59_v28 = vmul.f32 %v58_v24, %v48_v22  ;;  %v60_v29 = vmul.f32 %v58_v24, %v53_v23 }
  0x9b   :  { %v67_v26 = vpop.permute.xlu1 %66  ;;  %v63_v27 = vpop.permute.xlu0 %62 }
  0x9c   :  { %v74_v30 = vmul.f32 %v72_v25, %v67_v26  ;;  %v73_v31 = vmul.f32 %v72_v25, %v63_v27 }
  0x9e   :  { %v76_v33 = vadd.f32 %v74_v30, %v60_v29  ;;  %v75_v34 = vadd.f32 %v73_v31, %v59_v28 }
  0xa0   :  { %v84_v35 = vadd.f32 %v219_v32, %v75_v34  ;;  %v85_v36 = vadd.f32 %v219_v32, %v76_v33 }
  0xa2   :  { %v86_v37 = vmax.f32 %v84_v35, 0.0  ;;  %v87_v38 = vmax.f32 %v85_v36, 0.0 }
  0xa4   :  { %251 = vmatprep.mubr.msk.f32.mxu0 %vm103_vm0, %v86_v37 }
  0xa5   :  { %252 = vmatmul.mubr.msk.f32.vlgmr.msra.gmra.mrb[0].mxu0 %vm103_vm0, %v87_v38 }
 0x178   :  { %v253_v40 = vpop.f32.mrb[0].mxu0 }
 0x179   :  { %v182_v41 = vadd.f32 %v253_v40, %v220_v39  ;;  %v176_v42 = vpop.f32.mrb[1].mxu0 }
 0x17a   :  { %v177_v43 = vadd.f32 %v220_v39, %v176_v42 }
 0x17b   :  { %v186_v45 = vmax.f32 %v182_v41, 0.0 }
 0x17c   :  { %v185_v46 = vmax.f32 %v177_v43, 0.0 }
 0x17d   :  { %v195_v47 = vmul.f32 %v223_v44, %v186_v45 }
 0x17e   :  { %v194_v48 = vmul.f32 %v223_v44, %v185_v46 }
 0x17f   :  { %v199_v49 = vsel %vm103_vm0, %v195_v47, 0.0 }
 0x180   :  { %200 = vadd.xlane.f32.xlu0 %v199_v49  ;;  %v196_v50 = vsel %vm103_vm0, %v194_v48, 0.0 }
 0x181   :  { %197 = vadd.xlane.f32.xlu1 %v196_v50 }
 0x20d   :  { %v201_v52 = vpop.xlane.xlu0 %200 }
 0x20e   :  { %v210_v53 = vadd.f32 %v224_v51, %v201_v52  ;;  %v198_v54 = vpop.xlane.xlu1 %197 }
 0x20f   :  { %v209_v55 = vadd.f32 %v224_v51, %v198_v54 }
 0x210   :  { %213 = vst.msk [vmem:[%s398_s7 + $0x8] sm:$0xff] %vm211_vm1, %v210_v53 }
 0x211   :  { %212 = vst.msk [vmem:[%s398_s7] sm:$0xff] %vm211_vm1, %v209_v55 }
 0x212   :  { %218 = vsyncpa [#allocation4], 1 }

</bundles_post_ra>
